<compile_context>
chip_gen: v7x
topology: tpu7x:2x2x1
jax: 0.10.0
libtpu: 0.0.40
codegen_flags: <defaults>
</compile_context>

<pallas_src>
import functools

import jax
import jax.numpy as jnp
from jax import lax
from jax.experimental import pallas as pl
from jax.experimental.pallas import tpu as pltpu


# -----------------------------------------------------------------------------
# Small helpers
# -----------------------------------------------------------------------------
def _round_up(x, m):
    return ((x + m - 1) // m) * m


def _pad2(a, shape):
    out = jnp.zeros(shape, a.dtype)
    return out.at[: a.shape[0], : a.shape[1]].set(a)


def _vmem_limit_bytes():
    """Generation-aware scoped-VMEM limit: ~96 MiB on 128 MiB parts, ~48 MiB on 64 MiB parts."""
    try:
        info = pltpu.get_tpu_info()
        cap = getattr(info, "vmem_capacity_bytes", None) or (64 << 20)
    except Exception:  # interpret mode / unknown backend
        cap = 64 << 20
    return int(max(32 << 20, min(int(cap * 0.75), 100 << 20)))


def _pick_row_tile(n_pad, itemsize, budget_bytes=4 << 20):
    """Largest power-of-two row tile (<=1024) dividing n_pad whose adjacency tile fits budget."""
    max_rows = max(8, budget_bytes // (n_pad * itemsize))
    for cand in (1024, 512, 256, 128, 64, 32, 16, 8):
        if cand <= max_rows and n_pad % cand == 0:
            return cand
    return 8


# -----------------------------------------------------------------------------
# Pallas kernel: one row tile of   out = A_hat @ R + b
# plus per-tile BatchNorm partial statistics (sum, sum of squares) with padded
# rows masked out.  Used for both GCN layers.
# -----------------------------------------------------------------------------
def gcn_propagate_kernel(adj_ref, r_ref, b_ref, out_ref, stats_ref, *,
                         n_real: int, tile_n: int):
    # adj_ref : (tile_n, n_pad) bf16   -- streamed row tile of A_hat (double-buffered)
    # r_ref   : (n_pad, feat)   bf16   -- resident right operand (X@W1 or H@W2)
    # b_ref   : (1, feat)       f32    -- conv bias (resident)
    # out_ref : (tile_n, feat)  f32    -- raw (pre-BatchNorm) layer output rows
    # stats_ref: (1, 2, feat)   f32    -- [column sum ; column sum of squares] for this tile
    y = jnp.dot(adj_ref[...], r_ref[...],
                preferred_element_type=jnp.float32) + b_ref[...]
    out_ref[...] = y

    # Mask rows past the real node count so BatchNorm statistics stay unbiased.
    row0 = pl.program_id(0) * tile_n
    rows = row0 + lax.broadcasted_iota(jnp.int32, (tile_n, 1), 0)
    ym = jnp.where(rows < n_real, y, 0.0)
    s = jnp.sum(ym, axis=0, keepdims=True)
    ss = jnp.sum(ym * ym, axis=0, keepdims=True)
    stats_ref[...] = jnp.concatenate([s, ss], axis=0)[None]


def _gcn_propagate(adj, r, bias, n_real):
    """Row-tiled, pipelined, megacore-parallel A_hat @ R + bias with BN partial stats."""
    n_pad = adj.shape[0]
    feat = r.shape[1]
    tile_n = _pick_row_tile(n_pad, adj.dtype.itemsize)
    n_tiles = n_pad // tile_n

    flops = 2 * n_pad * n_pad * feat
    bytes_accessed = (adj.size * adj.dtype.itemsize      # streamed adjacency
                      + r.size * r.dtype.itemsize        # resident operand (fetched once)
                      + n_pad * feat * 4                 # f32 output
                      + n_tiles * 2 * feat * 4           # per-tile stats
                      + feat * 4)                        # bias

    out, stats = pl.pallas_call(
        functools.partial(gcn_propagate_kernel, n_real=n_real, tile_n=tile_n),
        grid=(n_tiles,),
        in_specs=[
            # A_hat row tiles stream from HBM, double-buffered by the pipeline.
            pl.BlockSpec((tile_n, n_pad), lambda i: (i, 0)),
            # Constant block index -> fetched once, kept resident; single-buffered
            # so it does not double its VMEM footprint.
            pl.BlockSpec((n_pad, feat), lambda i: (0, 0), pipeline_mode=pl.Buffered(1)),
            pl.BlockSpec((1, feat), lambda i: (0, 0), pipeline_mode=pl.Buffered(1)),
        ],
        out_specs=[
            pl.BlockSpec((tile_n, feat), lambda i: (i, 0)),
            pl.BlockSpec((1, 2, feat), lambda i: (i, 0, 0)),
        ],
        out_shape=[
            jax.ShapeDtypeStruct((n_pad, feat), jnp.float32),
            jax.ShapeDtypeStruct((n_tiles, 2, feat), jnp.float32),
        ],
        compiler_params=pltpu.CompilerParams(
            dimension_semantics=("parallel",),          # v7x: split row tiles over 2 TCs
            vmem_limit_bytes=_vmem_limit_bytes(),
        ),
        cost_estimate=pl.CostEstimate(flops=int(flops), transcendentals=0,
                                      bytes_accessed=int(bytes_accessed)),
    )(adj, r, bias)
    return out, stats


def _finalize_batchnorm(stats, n_real, eps):
    """Reduce per-tile partial stats -> (mean, 1/sqrt(var+eps)); biased var (BN training mode)."""
    s = jnp.sum(stats[:, 0, :], axis=0, keepdims=True)
    ss = jnp.sum(stats[:, 1, :], axis=0, keepdims=True)
    mean = s / n_real
    var = jnp.maximum(ss / n_real - mean * mean, 0.0)
    return mean, lax.rsqrt(var + eps)


# -----------------------------------------------------------------------------
# Fused dense adjacency build:  A_hat = D^-1/2 (A + I_remaining) D^-1/2
# Degrees come from the edge list; normalised edge weights are scattered
# directly into the padded bf16 array (single N^2 write pass).
# -----------------------------------------------------------------------------
def normalized_adjacency(edge_index, num_nodes, n_pad, dtype=jnp.bfloat16):
    src, dst = edge_index[0], edge_index[1]
    ones = jnp.ones(src.shape, jnp.float32)
    # message flow source -> target; duplicate edges sum (matches PyG scatter-add)
    in_deg = jnp.zeros((num_nodes,), jnp.float32).at[dst].add(ones)
    self_cnt = jnp.zeros((num_nodes,), jnp.float32).at[dst].add(
        jnp.where(src == dst, 1.0, 0.0))
    # add_remaining_self_loops: +1 only for nodes without an existing self loop
    deg = in_deg + jnp.where(self_cnt > 0, 0.0, 1.0)
    dinv = jnp.where(deg > 0, lax.rsqrt(deg), 0.0)

    vals = (dinv[dst] * dinv[src]).astype(dtype)
    a = jnp.zeros((n_pad, n_pad), dtype).at[dst, src].add(vals)
    idx = jnp.arange(num_nodes)
    diag_add = jnp.where(self_cnt > 0, 0.0, dinv * dinv).astype(dtype)
    a = a.at[idx, idx].add(diag_add)
    return a


# -----------------------------------------------------------------------------
# Encoder forward:  conv1 -> batch1 -> relu -> conv2 -> batch2
# -----------------------------------------------------------------------------
def gae_encoder(params, x, edge_index, *, eps=1e-5, adj_dtype=jnp.bfloat16):
    n_real, f_in = x.shape
    h_dim = params["w1"].shape[1]
    o_dim = params["w2"].shape[1]
    # TODO(synk): pad to 256 on v6e/v7x once real feature dims exceed 128 (wider MXU);
    #             at the current sizes 128 keeps every MXU result tile full on all generations.
    h_pad = _round_up(h_dim, 128)
    o_pad = _round_up(o_dim, 128)
    n_pad = _round_up(n_real, 128)

    adj = normalized_adjacency(edge_index, n_real, n_pad, adj_dtype)

    # Zero-padded params: padded feature columns stay exactly zero through both layers
    # (zero weights / bias / gamma / beta), so slicing them off at the end is exact.
    w1 = _pad2(params["w1"], (f_in, h_pad))
    b1 = _pad2(params["b1"], (1, h_pad))
    g1 = _pad2(params["gamma1"], (1, h_pad))
    be1 = _pad2(params["beta1"], (1, h_pad))
    w2 = _pad2(params["w2"], (h_pad, o_pad))
    b2 = _pad2(params["b2"], (1, o_pad))
    g2 = _pad2(params["gamma2"], (1, o_pad))
    be2 = _pad2(params["beta2"], (1, o_pad))

    # ---- layer 1: A_hat @ (X @ W1) + b1 -> BatchNorm (batch stats over real rows) -> ReLU
    x_pad = jnp.zeros((n_pad, f_in), jnp.float32).at[:n_real].set(x.astype(jnp.float32))
    xw1 = jnp.dot(x_pad, w1).astype(adj_dtype)          # (n_pad, h_pad): tiny, lane-dense
    h_raw, st1 = _gcn_propagate(adj, xw1, b1, n_real)
    mean1, inv1 = _finalize_batchnorm(st1, n_real, eps)
    h = jnp.maximum((h_raw - mean1) * inv1 * g1 + be1, 0.0)

    # ---- layer 2: A_hat @ (H @ W2) + b2 -> BatchNorm
    hw2 = jnp.dot(h, w2).astype(adj_dtype)              # (n_pad, o_pad): tiny, lane-dense
    z_raw, st2 = _gcn_propagate(adj, hw2, b2, n_real)
    mean2, inv2 = _finalize_batchnorm(st2, n_real, eps)
    z = (z_raw - mean2) * inv2 * g2 + be2

    return z[:n_real, :o_dim]


# -----------------------------------------------------------------------------
# Deterministic init mirroring reset(): glorot weights, zero bias, BN gamma=1 / beta=0
# -----------------------------------------------------------------------------
def init_params(key, in_channels, out_channels):
    h1 = 2 * out_channels
    k1, k2 = jax.random.split(key)

    def glorot(k, fan_in, fan_out):
        limit = jnp.sqrt(6.0 / (fan_in + fan_out))
        return jax.random.uniform(k, (fan_in, fan_out), jnp.float32, -limit, limit)

    return {
        "w1": glorot(k1, in_channels, h1),
        "b1": jnp.zeros((1, h1), jnp.float32),
        "gamma1": jnp.ones((1, h1), jnp.float32),
        "beta1": jnp.zeros((1, h1), jnp.float32),
        "w2": glorot(k2, h1, out_channels),
        "b2": jnp.zeros((1, out_channels), jnp.float32),
        "gamma2": jnp.ones((1, out_channels), jnp.float32),
        "beta2": jnp.zeros((1, out_channels), jnp.float32),
    }


if __name__ == "__main__":
    key = jax.random.PRNGKey(0)
    k_x, k_p, _ = jax.random.split(key, 3)

    num_nodes = 16
    in_channels = 8
    out_channels = 8  # encoder output dim; hidden = 2*out = 16

    # node features (N, in_channels)
    x = jax.random.normal(k_x, (num_nodes, in_channels), jnp.float32)

    # deterministic small graph: a ring plus a few chords, both directions
    ring_src = jnp.arange(num_nodes)
    ring_dst = (ring_src + 1) % num_nodes
    chord_src = jnp.array([0, 3, 5, 7], jnp.int32)
    chord_dst = jnp.array([8, 11, 13, 2], jnp.int32)
    src = jnp.concatenate([ring_src, ring_dst, chord_src, chord_dst])
    dst = jnp.concatenate([ring_dst, ring_src, chord_dst, chord_src])
    edge_index = jnp.stack([src, dst]).astype(jnp.int32)  # (2, 40)

    params = init_params(k_p, in_channels, out_channels)

    z = jax.jit(gae_encoder)(params, x, edge_index)
    jax.block_until_ready(z)
    assert z.shape == (num_nodes, out_channels)
    assert bool(jnp.all(jnp.isfinite(z)))
    print("KERNEL_OK")
</pallas_src>

<mosaic_0001>
module attributes {stable_mosaic.version = 11 : i64} {
  func.func @gcn_propagate_kernel(%arg0: i32, %arg1: memref<128x128xbf16, #tpu.memory_space<vmem>>, %arg2: memref<128x128xbf16, #tpu.memory_space<vmem>>, %arg3: memref<1x128xf32, #tpu.memory_space<vmem>>, %arg4: memref<128x128xf32, #tpu.memory_space<vmem>>, %arg5: memref<1x2x128xf32, #tpu.memory_space<vmem>>) attributes {dimension_semantics = [#tpu.dimension_semantics<parallel>], iteration_bounds = array<i64: 1>, scalar_prefetch = 0 : i64, scratch_operands = 0 : i64, tpu.core_type = #tpu.core_type<tc>, window_params = [{transform_indices = @transform_0, window_bounds = array<i64: 128, 128>}, {pipeline_mode = #tpu.pipeline_mode<synchronous>, transform_indices = @transform_1, window_bounds = array<i64: 128, 128>}, {pipeline_mode = #tpu.pipeline_mode<synchronous>, transform_indices = @transform_2, window_bounds = array<i64: 1, 128>}, {transform_indices = @transform_3, window_bounds = array<i64: 128, 128>}, {transform_indices = @transform_4, window_bounds = array<i64: 1, 2, 128>}]} {
    %c0 = arith.constant 0 : index
    %c0_0 = arith.constant 0 : index
    %0 = vector.load %arg1[%c0, %c0_0] : memref<128x128xbf16, #tpu.memory_space<vmem>>, vector<128x128xbf16>
    %c0_1 = arith.constant 0 : index
    %c0_2 = arith.constant 0 : index
    %1 = vector.load %arg2[%c0_1, %c0_2] : memref<128x128xbf16, #tpu.memory_space<vmem>>, vector<128x128xbf16>
    %cst = arith.constant dense<0.000000e+00> : vector<128x128xf32>
    %2 = tpu.matmul %0, %1, %cst {dimension_numbers = #tpu.dot_dimension_numbers<[1], [0], [0], [1], [0, 0, 1, 1], [], []>} : vector<128x128xbf16>, vector<128x128xbf16>, vector<128x128xf32> -> vector<128x128xf32>
    %c0_3 = arith.constant 0 : index
    %c0_4 = arith.constant 0 : index
    %3 = vector.load %arg3[%c0_3, %c0_4] : memref<1x128xf32, #tpu.memory_space<vmem>>, vector<1x128xf32>
    %4 = vector.broadcast %3 : vector<1x128xf32> to vector<128x128xf32>
    %5 = arith.addf %2, %4 : vector<128x128xf32>
    %c0_5 = arith.constant 0 : index
    %c0_6 = arith.constant 0 : index
    %6 = vector.load %arg4[%c0_5, %c0_6] : memref<128x128xf32, #tpu.memory_space<vmem>>, vector<128x128xf32>
    tpu.vector_store %arg4[%c0_5, %c0_6], %5 {strides = array<i32>} : memref<128x128xf32, #tpu.memory_space<vmem>>, vector<128x128xf32>,
    %c128_i32 = arith.constant 128 : i32
    %7 = arith.muli %arg0, %c128_i32 : i32
    %8 = tpu.iota {dimensions = array<i32: 0>} : vector<128x1xi32>
    %9 = vector.broadcast %7 : i32 to vector<128x1xi32>
    %10 = arith.addi %9, %8 : vector<128x1xi32>
    %c16_i32 = arith.constant 16 : i32
    %11 = vector.broadcast %c16_i32 : i32 to vector<128x1xi32>
    %12 = arith.cmpi slt, %10, %11 : vector<128x1xi32>
    %cst_7 = arith.constant 0.000000e+00 : f32
    %13 = vector.shape_cast %12 : vector<128x1xi1> to vector<128x1xi1>
    %14 = vector.broadcast %13 : vector<128x1xi1> to vector<128x128xi1>
    %15 = vector.broadcast %cst_7 : f32 to vector<128x128xf32>
    %16 = arith.select %14, %5, %15 : vector<128x128xi1>, vector<128x128xf32>
    %cst_8 = arith.constant dense<0.000000e+00> : vector<128xf32>
    %17 = vector.multi_reduction <add>, %16, %cst_8 [0] : vector<128x128xf32> to vector<128xf32>
    %18 = vector.shape_cast %17 : vector<128xf32> to vector<1x128xf32>
    %19 = arith.mulf %16, %16 : vector<128x128xf32>
    %cst_9 = arith.constant dense<0.000000e+00> : vector<128xf32>
    %20 = vector.multi_reduction <add>, %19, %cst_9 [0] : vector<128x128xf32> to vector<128xf32>
    %21 = vector.shape_cast %20 : vector<128xf32> to vector<1x128xf32>
    %22 = tpu.concatenate %18, %21 in 0 : vector<1x128xf32>, vector<1x128xf32> -> vector<2x128xf32>
    %23 = vector.shape_cast %22 : vector<2x128xf32> to vector<1x2x128xf32>
    %c0_10 = arith.constant 0 : index
    %c0_11 = arith.constant 0 : index
    %c0_12 = arith.constant 0 : index
    %24 = vector.load %arg5[%c0_10, %c0_11, %c0_12] : memref<1x2x128xf32, #tpu.memory_space<vmem>>, vector<1x2x128xf32>
    tpu.vector_store %arg5[%c0_10, %c0_11, %c0_12], %23 {strides = array<i32>} : memref<1x2x128xf32, #tpu.memory_space<vmem>>, vector<1x2x128xf32>,
    return
  }
  func.func @transform_0(%arg0: i32) -> (i32, i32) {
    %c0_i32 = arith.constant 0 : i32
    %c0_i32_0 = arith.constant 0 : i32
    return %arg0, %c0_i32 : i32, i32
  }
  func.func @transform_1(%arg0: i32) -> (i32, i32) {
    %c0_i32 = arith.constant 0 : i32
    %c0_i32_0 = arith.constant 0 : i32
    %c0_i32_1 = arith.constant 0 : i32
    return %c0_i32, %c0_i32_0 : i32, i32
  }
  func.func @transform_2(%arg0: i32) -> (i32, i32) {
    %c0_i32 = arith.constant 0 : i32
    %c0_i32_0 = arith.constant 0 : i32
    %c0_i32_1 = arith.constant 0 : i32
    return %c0_i32, %c0_i32_0 : i32, i32
  }
  func.func @transform_3(%arg0: i32) -> (i32, i32) {
    %c0_i32 = arith.constant 0 : i32
    %c0_i32_0 = arith.constant 0 : i32
    return %arg0, %c0_i32 : i32, i32
  }
  func.func @transform_4(%arg0: i32) -> (i32, i32, i32) {
    %c0_i32 = arith.constant 0 : i32
    %c0_i32_0 = arith.constant 0 : i32
    %c0_i32_1 = arith.constant 0 : i32
    return %arg0, %c0_i32, %c0_i32_0 : i32, i32, i32
  }
}

</mosaic_0001>

<bundles_post_ra>
// kernel: gae_encoder.2
= control target key start
LH: loop header
LB: loop body
LE: loop exit
PB: predicated region body
PF: predicated region fallthrough
CT: control target
= control target key end

     0   :  { %vm422_vm0 = vcmask 1040384   ;;  %s657_s1 = inlined_call_operand.vmem [shape: bf16[128,128], index: 1, kind: input, shape index: {}]   ;;  %s658_s0 = inlined_call_operand.vmem [shape: bf16[128,128], index: 0, kind: input, shape index: {}]   ;;  %s659_s2 = inlined_call_operand.vmem [shape: f32[1,128], index: 2, kind: input, shape index: {}]   ;;  %s660_s3 = inlined_call_operand.vmem [shape: f32[128,128], index: 3, kind: output, shape index: {0}]   ;;  %s661_s4 = inlined_call_operand.vmem [shape: f32[1,2,128], index: 4, kind: output, shape index: {1}]  }
   0x1   :  { %v514_v0 = vld [vmem:[%s657_s1] sm:$0xff]   ;;  %v515_v1 = vld [vmem:[%s657_s1 + $0x8] sm:$0xff]   ;;  %v516_v2 = vld [vmem:[%s657_s1 + $0x10] sm:$0xff]  }
   0x2   :  { %466 = vmatprep.subr.bf16.mxu0 %v514_v0  ;;  %498 = vmatprep.subr.bf16.mxu1 %v514_v0  ;;  %v517_v3 = vld [vmem:[%s657_s1 + $0x18] sm:$0xff]   ;;  %v522_v4 = vld [vmem:[%s658_s0] sm:$0xff]   ;;  %v519_v7 = vld [vmem:[%s657_s1 + $0x28] sm:$0xff]  }
   0x3   :  { %467 = vmatpush3.bf16.msra.mxu0 %v514_v0  ;;  %506 = vmatpush3.bf16.msra.mxu1 %v514_v0  ;;  %v524_v5 = vld [vmem:[%s658_s0 + $0x20] sm:$0xff]   ;;  %v520_v8 = vld [vmem:[%s657_s1 + $0x30] sm:$0xff]   ;;  %v521_v9 = vld [vmem:[%s657_s1 + $0x38] sm:$0xff]  }
   0x4   :  { %468 = vmatprep.subr.bf16.mxu0 %v515_v1  ;;  %499 = vmatprep.subr.bf16.mxu1 %v515_v1  ;;  %v518_v6 = vld [vmem:[%s657_s1 + $0x20] sm:$0xff]   ;;  %v523_v10 = vld [vmem:[%s658_s0 + $0x8] sm:$0xff]   ;;  %v526_v12 = vld [vmem:[%s658_s0 + $0x10] sm:$0xff]  }
   0x5   :  { %482 = vmatprep.mubr.bf16.mxu0 %v522_v4  ;;  %490 = vmatprep.mubr.bf16.mxu1 %v524_v5  ;;  %v525_v11 = vld [vmem:[%s658_s0 + $0x28] sm:$0xff]   ;;  %v527_v13 = vld [vmem:[%s658_s0 + $0x30] sm:$0xff]   ;;  %v528_v14 = vld [vmem:[%s658_s0 + $0x18] sm:$0xff]  }
   0x6   :  { %v529_v15 = vld [vmem:[%s658_s0 + $0x38] sm:$0xff]   ;;  %v433_v16 = vld [vmem:[%s659_s2] ss:$0 sm:$0xff] }
   0x7   :  { %469 = vmatpush3.bf16.msra.mxu0 %v515_v1  ;;  %507 = vmatpush3.bf16.msra.mxu1 %v515_v1 }
   0x8   :  { %470 = vmatprep.subr.bf16.mxu0 %v516_v2  ;;  %500 = vmatprep.subr.bf16.mxu1 %v516_v2 }
   0xb   :  { %471 = vmatpush3.bf16.msra.mxu0 %v516_v2  ;;  %508 = vmatpush3.bf16.msra.mxu1 %v516_v2 }
   0xc   :  { %472 = vmatprep.subr.bf16.mxu0 %v517_v3  ;;  %501 = vmatprep.subr.bf16.mxu1 %v517_v3 }
   0xf   :  { %473 = vmatpush3.bf16.msra.mxu0 %v517_v3  ;;  %509 = vmatpush3.bf16.msra.mxu1 %v517_v3 }
  0x10   :  { %474 = vmatprep.subr.bf16.mxu0 %v518_v6  ;;  %502 = vmatprep.subr.bf16.mxu1 %v518_v6 }
  0x13   :  { %475 = vmatpush3.bf16.msra.mxu0 %v518_v6  ;;  %510 = vmatpush3.bf16.msra.mxu1 %v518_v6 }
  0x14   :  { %476 = vmatprep.subr.bf16.mxu0 %v519_v7  ;;  %503 = vmatprep.subr.bf16.mxu1 %v519_v7 }
  0x17   :  { %477 = vmatpush3.bf16.msra.mxu0 %v519_v7  ;;  %511 = vmatpush3.bf16.msra.mxu1 %v519_v7 }
  0x18   :  { %478 = vmatprep.subr.bf16.mxu0 %v520_v8  ;;  %504 = vmatprep.subr.bf16.mxu1 %v520_v8 }
  0x1b   :  { %479 = vmatpush3.bf16.msra.mxu0 %v520_v8  ;;  %512 = vmatpush3.bf16.msra.mxu1 %v520_v8 }
  0x1c   :  { %480 = vmatprep.subr.bf16.mxu0 %v521_v9  ;;  %505 = vmatprep.subr.bf16.mxu1 %v521_v9 }
  0x1f   :  { %481 = vmatpush3.bf16.msra.mxu0 %v521_v9  ;;  %513 = vmatpush3.bf16.msra.mxu1 %v521_v9 }
  0x22   :  { %483 = vmatmul.mubr.bf16.vlgmr.msra.gmra.mrb[0].mxu0 %v523_v10  ;;  %491 = vmatmul.mubr.bf16.vlgmr.msra.gmra.mrb[0].mxu1 %v525_v11 }
  0x23   :  { %486 = vmatprep.mubr.bf16.mxu0 %v526_v12  ;;  %494 = vmatprep.mubr.bf16.mxu1 %v527_v13 }
  0x2a   :  { %487 = vmatmul.mubr.bf16.gmra.mrb[4].mxu0 %v528_v14  ;;  %495 = vmatmul.mubr.bf16.gmra.mrb[4].mxu1 %v529_v15 }
  0xf5   :  { %v484_v17 = vpop.f32.mrb[0].mxu0  ;;  %v492_v18 = vpop.f32.mrb[0].mxu1 }
  0xf6   :  { %v195_v19 = vadd.f32 %v484_v17, %v433_v16  ;;  %v186_v20 = vpop.f32.mrb[1].mxu0  ;;  %v227_v21 = vadd.f32 %v492_v18, %v433_v16  ;;  %v218_v22 = vpop.f32.mrb[1].mxu1 }
  0xf7   :  { %v187_v23 = vadd.f32 %v433_v16, %v186_v20  ;;  %v485_v24 = vpop.f32.mrb[2].mxu0  ;;  %v219_v25 = vadd.f32 %v433_v16, %v218_v22  ;;  %v493_v26 = vpop.f32.mrb[2].mxu1 }
  0xf8   :  { %251 = vst [vmem:[%s660_s3 + $0x10] sm:$0xff] %v195_v19  ;;  %v198_v27 = vadd.f32 %v485_v24, %v433_v16  ;;  %v189_v28 = vpop.f32.mrb[3].mxu0  ;;  %259 = vst [vmem:[%s660_s3 + $0x50] sm:$0xff] %v227_v21  ;;  %v230_v29 = vadd.f32 %v493_v26, %v433_v16  ;;  %v221_v30 = vpop.f32.mrb[3].mxu1 }
  0xf9   :  { %249 = vst [vmem:[%s660_s3] sm:$0xff] %v187_v23  ;;  %v190_v31 = vadd.f32 %v433_v16, %v189_v28  ;;  %257 = vst [vmem:[%s660_s3 + $0x40] sm:$0xff] %v219_v25  ;;  %v222_v32 = vadd.f32 %v433_v16, %v221_v30  ;;  %v385_v33 = vmul.f32 %v187_v23, %v187_v23 }
  0xfa   :  { %252 = vst [vmem:[%s660_s3 + $0x18] sm:$0xff] %v198_v27  ;;  %260 = vst [vmem:[%s660_s3 + $0x58] sm:$0xff] %v230_v29 }
  0xfb   :  { %250 = vst [vmem:[%s660_s3 + $0x8] sm:$0xff] %v190_v31  ;;  %v364_v34 = vadd.f32 %v190_v31, %v187_v23  ;;  %v386_v35 = vmul.f32 %v190_v31, %v190_v31  ;;  %258 = vst [vmem:[%s660_s3 + $0x48] sm:$0xff] %v222_v32 }
  0xfd   :  { %v379_v36 = vrot.slane %v364_v34, 4  ;;  %v401_v37 = vadd.f32 %v386_v35, %v385_v33  ;;  %v488_v38 = vpop.f32.mrb[4].mxu0  ;;  %v496_v39 = vpop.f32.mrb[4].mxu1 }
  0xfe   :  { %v211_v40 = vadd.f32 %v488_v38, %v433_v16  ;;  %v243_v41 = vadd.f32 %v496_v39, %v433_v16  ;;  %v202_v42 = vpop.f32.mrb[5].mxu0  ;;  %v234_v43 = vpop.f32.mrb[5].mxu1 }
  0xff   :  { %v380_v44 = vadd.f32 %v379_v36, %v364_v34  ;;  %v416_v45 = vrot.slane %v401_v37, 4  ;;  %v203_v46 = vadd.f32 %v433_v16, %v202_v42  ;;  %v235_v47 = vadd.f32 %v433_v16, %v234_v43  ;;  %v489_v48 = vpop.f32.mrb[6].mxu0  ;;  %v497_v49 = vpop.f32.mrb[6].mxu1 }
 0x100   :  { %255 = vst [vmem:[%s660_s3 + $0x30] sm:$0xff] %v211_v40  ;;  %263 = vst [vmem:[%s660_s3 + $0x70] sm:$0xff] %v243_v41  ;;  %v214_v50 = vadd.f32 %v489_v48, %v433_v16  ;;  %v246_v51 = vadd.f32 %v497_v49, %v433_v16  ;;  %v205_v52 = vpop.f32.mrb[7].mxu0  ;;  %v237_v53 = vpop.f32.mrb[7].mxu1 }
 0x101   :  { %v381_v54 = vrot.slane %v380_v44, 2  ;;  %v417_v55 = vadd.f32 %v416_v45, %v401_v37  ;;  %253 = vst [vmem:[%s660_s3 + $0x20] sm:$0xff] %v203_v46  ;;  %261 = vst [vmem:[%s660_s3 + $0x60] sm:$0xff] %v235_v47  ;;  %v206_v56 = vadd.f32 %v433_v16, %v205_v52  ;;  %v238_v57 = vadd.f32 %v433_v16, %v237_v53 }
 0x102   :  { %256 = vst [vmem:[%s660_s3 + $0x38] sm:$0xff] %v214_v50  ;;  %264 = vst [vmem:[%s660_s3 + $0x78] sm:$0xff] %v246_v51 }
 0x103   :  { %v382_v58 = vadd.f32 %v381_v54, %v380_v44  ;;  %v418_v59 = vrot.slane %v417_v55, 2  ;;  %254 = vst [vmem:[%s660_s3 + $0x28] sm:$0xff] %v206_v56  ;;  %262 = vst [vmem:[%s660_s3 + $0x68] sm:$0xff] %v238_v57 }
 0x105   :  { %v383_v60 = vrot.slane %v382_v58, 1  ;;  %v419_v61 = vadd.f32 %v418_v59, %v417_v55 }
 0x107   :  { %v420_v62 = vrot.slane %v419_v61, 1  ;;  %v384_v63 = vadd.f32 %v383_v60, %v382_v58 }
 0x109   :  { %v421_v0 = vadd.f32 %v420_v62, %v419_v61 }
 0x10b   :  { %v423_v1 = vsel %vm422_vm0, %v384_v63, %v421_v0 }
 0x10c   :  { %424 = vst [vmem:[%s661_s4] sm:$0x3] %v423_v1 }

</bundles_post_ra>
